<compile_context>
chip_gen: v6e
topology: v6e:2x2x1
jax: 0.10.0
libtpu: 0.0.40
codegen_flags: <defaults>
</compile_context>

<pallas_src>
import jax
import jax.numpy as jnp
from jax.experimental import pallas as pl
from jax.experimental.pallas import tpu as pltpu


_GATHER_ROWS = 32  # dictionary rows fetched per grid step in the gather path


def _round_up(a, b):
    return ((a + b - 1) // b) * b


# ---------------------------------------------------------------------------
# Hardware introspection (per-generation budgets; v4/v5p/v7x have 2 TensorCores).
# ---------------------------------------------------------------------------
def _vmem_capacity_bytes():
    try:
        cap = getattr(pltpu.get_tpu_info(), "vmem_capacity_bytes", None)
        if cap:
            return int(cap)
    except Exception:
        pass
    return 64 << 20  # conservative (v7x-sized) fallback


def _tensorcores_per_chip():
    try:
        kind = jax.devices()[0].device_kind.lower()
    except Exception:
        kind = ""
    return 2 if any(t in kind for t in ("v4", "v5p", "v7")) else 1


# ---------------------------------------------------------------------------
# Kernels
# ---------------------------------------------------------------------------
def _onehot_matmul_kernel(x_ref, dict_ref, out_ref):
    # x_ref:    (TM, V)     row tile of x, full vocab in lanes
    # dict_ref: (V, E_pad)  full dictionary resident in VMEM (constant block)
    # out_ref:  (TM, E_pad)
    x = x_ref[...]
    tm, v = x.shape
    # First-max argmax matches torch.argmax tie-breaking.
    tokens = jnp.argmax(x, axis=-1, keepdims=True)                 # (TM, 1) int32
    lane_ids = jax.lax.broadcasted_iota(jnp.int32, (tm, v), 1)     # (TM, V)
    # one-hot built directly in the dictionary dtype (exact: entries are 0/1).
    one_hot = (lane_ids == tokens).astype(dict_ref.dtype)
    emb = jnp.dot(one_hot, dict_ref[...], preferred_element_type=jnp.float32)
    out_ref[...] = emb.astype(out_ref.dtype)


def _argmax_kernel(x_ref, tok_ref):
    tok_ref[...] = jnp.argmax(x_ref[...], axis=-1, keepdims=True).astype(jnp.int32)


def _make_gather_kernel(g_rows):
    def kernel(tok_ref, dict_hbm, out_ref, sems):
        # tok_ref: (BNg,) int32 in SMEM (scalar prefetch); dict_hbm: (V, E) in HBM;
        # out_ref: (g_rows, E) VMEM output block; sems: (g_rows,) DMA semaphores.
        base = pl.program_id(0) * g_rows
        copies = []
        for g in range(g_rows):
            cp = pltpu.make_async_copy(dict_hbm.at[tok_ref[base + g]],
                                       out_ref.at[g], sems.at[g])
            cp.start()
            copies.append(cp)
        for cp in copies:
            cp.wait()
    return kernel


# ---------------------------------------------------------------------------
# Tiling helpers
# ---------------------------------------------------------------------------
def _auto_tile_rows(BN, per_row, fixed, budget, sublane, cores, cap_rows=1024):
    """Largest sublane-aligned row tile whose steady-state VMEM stays within budget."""
    avail = max(budget - fixed, sublane * per_row)   # never below one minimal tile
    cap = avail // max(per_row, 1)
    cap = min(cap, cap_rows, max((BN // sublane) * sublane, sublane))
    if cores > 1:
        # Leave at least one grid step per TensorCore so both cores get work.
        cap = min(cap, max(_round_up(pl.cdiv(BN, cores), sublane), sublane))
    return int(max((cap // sublane) * sublane, sublane))


# ---------------------------------------------------------------------------
# Forward paths
# ---------------------------------------------------------------------------
def _forward_matmul(x2, dictionary, BNp, V, E, E_pad, per_row, dict_resident,
                    budget, capacity, sublane, cores, tile_m):
    d_dtype = dictionary.dtype
    dict_p = dictionary if E_pad == E else jnp.pad(dictionary, ((0, 0), (0, E_pad - E)))

    if tile_m is None:
        tile_m = _auto_tile_rows(BNp, per_row, dict_resident, budget, sublane, cores)
    else:
        tile_m = max((int(tile_m) // sublane) * sublane, sublane)
    # Multi-TC chips: prefer a step count that divides evenly across the cores under
    # dimension_semantics=("parallel",); single-TC chips take the single largest tile.
    if cores > 1:
        gm = pl.cdiv(BNp, tile_m)
        gm_bal = _round_up(gm, cores)
        if gm_bal != gm:
            tile_m = max(_round_up(pl.cdiv(BNp, gm_bal), sublane), sublane)
    grid_m = pl.cdiv(BNp, tile_m)

    # Explicit scoped-VMEM limit: never below the true pipeline footprint (including
    # temporaries + dictionary), never above physical VMEM.
    footprint = dict_resident + tile_m * per_row
    vmem_limit = int(min(max(footprint * 5 // 4 + (2 << 20), 16 << 20), capacity))

    def call(dict_spec):
        return pl.pallas_call(
            _onehot_matmul_kernel,
            out_shape=jax.ShapeDtypeStruct((BNp, E_pad), d_dtype),
            grid_spec=pltpu.PrefetchScalarGridSpec(
                num_scalar_prefetch=0,
                grid=(grid_m,),
                in_specs=[
                    pl.BlockSpec((tile_m, V), lambda i: (i, 0)),   # streamed x row tile
                    dict_spec,                                     # constant dictionary
                ],
                out_specs=pl.BlockSpec((tile_m, E_pad), lambda i: (i, 0)),
            ),
            compiler_params=pltpu.CompilerParams(
                dimension_semantics=("parallel",),
                vmem_limit_bytes=vmem_limit,
            ),
        )(x2, dict_p)

    try:
        # The dictionary is a constant block: single-buffer it so only one copy is resident.
        out2 = call(pl.BlockSpec((V, E_pad), lambda i: (0, 0),
                                 pipeline_mode=pl.Buffered(1)))
    except Exception:
        # Version-compatibility fallback; the VMEM accounting above already assumed
        # a double-buffered dictionary, so tile_m / vmem_limit stay valid.
        out2 = call(pl.BlockSpec((V, E_pad), lambda i: (0, 0)))

    return out2 if E_pad == E else out2[:, :E]


def _forward_gather(x2, dictionary, BNp, V, E, budget, capacity, sublane, cores,
                    tile_m, x_bytes, d_bytes):
    # Pass 1: tiled argmax over the vocab axis -> int32 tokens.
    per_row = V * (3 * x_bytes + 4) + 2 * 4   # x stream + iota/compare temps + token out
    if tile_m is None:
        tile_am = _auto_tile_rows(BNp, per_row, 0, budget, sublane, cores)
    else:
        tile_am = max((int(tile_m) // sublane) * sublane, sublane)
    vmem_am = int(min(max(tile_am * per_row * 5 // 4 + (2 << 20), 16 << 20), capacity))
    tokens = pl.pallas_call(
        _argmax_kernel,
        out_shape=jax.ShapeDtypeStruct((BNp, 1), jnp.int32),
        grid_spec=pltpu.PrefetchScalarGridSpec(
            num_scalar_prefetch=0,
            grid=(pl.cdiv(BNp, tile_am),),
            in_specs=[pl.BlockSpec((tile_am, V), lambda i: (i, 0))],
            out_specs=pl.BlockSpec((tile_am, 1), lambda i: (i, 0)),
        ),
        compiler_params=pltpu.CompilerParams(
            dimension_semantics=("parallel",),
            vmem_limit_bytes=vmem_am,
        ),
    )(x2)

    # Pass 2: scalar-prefetched token ids drive per-row DMA gathers of dictionary rows
    # straight from HBM: the dictionary never needs to fit in VMEM and no V*E MXU FLOPs
    # are wasted. TODO(synk): tile the token prefetch for extremely large B*N (SMEM size).
    sub_d = max(8, 32 // d_bytes)
    g_rows = min(_GATHER_ROWS, max((BNp // sub_d) * sub_d, sub_d))
    tok_flat = tokens[:, 0]
    BNg = _round_up(BNp, g_rows)
    if BNg != BNp:
        tok_flat = jnp.pad(tok_flat, (0, BNg - BNp))   # tiny; keeps SMEM reads in bounds
    vmem_g = int(min(max(4 * g_rows * E * d_bytes + (2 << 20), 16 << 20), capacity))
    return pl.pallas_call(
        _make_gather_kernel(g_rows),
        out_shape=jax.ShapeDtypeStruct((BNp, E), dictionary.dtype),
        grid_spec=pltpu.PrefetchScalarGridSpec(
            num_scalar_prefetch=1,
            grid=(pl.cdiv(BNp, g_rows),),
            in_specs=[pl.BlockSpec(memory_space=pl.ANY)],   # dictionary stays in HBM
            out_specs=pl.BlockSpec((g_rows, E), lambda i, tok: (i, 0)),
            scratch_shapes=[pltpu.SemaphoreType.DMA((g_rows,))],
        ),
        compiler_params=pltpu.CompilerParams(
            dimension_semantics=("parallel",),
            vmem_limit_bytes=vmem_g,
        ),
    )(tok_flat, dictionary)


# ---------------------------------------------------------------------------
# Public wrapper
# ---------------------------------------------------------------------------
def one_hot_dictionary_forward(x, dictionary, *, tile_m=None, vmem_budget_bytes=None,
                               use_gather=None, gather_vocab_threshold=2048):
    """OneHotDictionary forward: Embedding(argmax(x, -1)).

    x: (B, N, V) float scores; dictionary: (V, E) -> (B, N, E) in dictionary.dtype.
    """
    B, N, V = x.shape
    Vd, E = dictionary.shape
    assert V == Vd, "vocab size mismatch between x and dictionary"
    BN = B * N

    x_bytes = jnp.dtype(x.dtype).itemsize
    d_bytes = jnp.dtype(dictionary.dtype).itemsize
    # Packed sublane multiple for the row tile: 8 for 4-byte, 16 for 2-byte, 32 for 1-byte.
    sublane = max(8, 32 // x_bytes, 32 // d_bytes)

    capacity = _vmem_capacity_bytes()
    cores = _tensorcores_per_chip()
    if vmem_budget_bytes is None:
        # ~70% of physical VMEM: ~90 MiB on v5e/v6e (128 MiB), ~45 MiB on v7x (64 MiB).
        vmem_budget_bytes = capacity * 7 // 10
    budget = int(vmem_budget_bytes)

    # Rows stream in the caller's layout (reshape is free); ragged last blocks are handled
    # by the pipeline instead of a wrapper-side pad/slice (which would cost a full extra
    # HBM read+write of x and out).  Only BN < one sublane gets a tiny pad.
    x2 = x.reshape(BN, V)
    row_pad = sublane - BN if BN < sublane else 0
    if row_pad:
        x2 = jnp.pad(x2, ((0, row_pad), (0, 0)))
    BNp = BN + row_pad

    # Lane-dense output stores: pad the emb dim to a multiple of 128 (zero dictionary
    # columns, sliced off after).  V / x is deliberately NOT lane-padded: that would
    # reintroduce a full HBM copy of x in the wrapper.
    E_pad = _round_up(E, 128)

    # Steady-state VMEM per row (matmul path), conservative w.r.t. a double-buffered dict:
    #   2*V*x_bytes (x stream) + 2*E_pad*d_bytes (out stream)
    #   + V*(x_bytes + 4 + d_bytes) in-kernel temporaries (x tile, lane iota, one-hot)
    #   + 4*E_pad f32 accumulator tile
    per_row = V * (3 * x_bytes + 4 + d_bytes) + E_pad * (2 * d_bytes + 4)
    dict_resident = 2 * V * E_pad * d_bytes
    fits = (budget - dict_resident) >= sublane * per_row

    if use_gather is None:
        # Large vocabularies, dictionaries that don't comfortably fit in VMEM, or integer
        # codebooks (v7x's MXU has no int path) take the two-pass gather path.
        use_gather = (V >= gather_vocab_threshold or not fits
                      or not jnp.issubdtype(dictionary.dtype, jnp.floating))

    if not use_gather:
        out2 = _forward_matmul(x2, dictionary, BNp, V, E, E_pad, per_row, dict_resident,
                               budget, capacity, sublane, cores, tile_m)
    else:
        out2 = _forward_gather(x2, dictionary, BNp, V, E, budget, capacity, sublane,
                               cores, tile_m, x_bytes, d_bytes)

    if row_pad:
        out2 = out2[:BN]
    return out2.reshape(B, N, E)


# ---------------------------------------------------------------------------
# Reference + self-test
# ---------------------------------------------------------------------------
def _reference(x, dictionary):
    return jnp.take(dictionary, jnp.argmax(x, axis=-1), axis=0)


def _run_case(key, B, N, V, E, x_dtype=jnp.float32, d_dtype=jnp.float32, **kwargs):
    k1, k2 = jax.random.split(key)
    x = jax.random.normal(k1, (B, N, V), dtype=jnp.float32).astype(x_dtype)
    d = jax.random.normal(k2, (V, E), dtype=jnp.float32).astype(d_dtype)
    out = jax.block_until_ready(one_hot_dictionary_forward(x, d, **kwargs))
    ref = _reference(x, d)
    assert out.shape == (B, N, E), f"bad shape {out.shape}"
    assert out.dtype == d.dtype, f"bad dtype {out.dtype}"
    assert jnp.allclose(out.astype(jnp.float32), ref.astype(jnp.float32), atol=1e-5), (
        f"mismatch vs reference for case {(B, N, V, E, x_dtype, d_dtype, kwargs)}")


if __name__ == "__main__":
    keys = jax.random.split(jax.random.PRNGKey(0), 5)
    # 1) Small shapes from the module's forward (x is (B, N, vocab)); E < 128 -> lane pad.
    _run_case(keys[0], 2, 8, 64, 32)
    # 2) B*N not divisible by the row tile -> ragged last block (no wrapper pad/slice).
    _run_case(keys[1], 3, 5, 64, 32)
    # 3) Larger shapes, lane-dense E (multiple of 128), larger auto row tile.
    _run_case(keys[2], 4, 64, 256, 128)
    # 4) bf16 dictionary -> bf16 one-hot x bf16 dictionary on the MXU (f32 accumulate).
    _run_case(keys[3], 2, 32, 128, 128, d_dtype=jnp.bfloat16)
    # 5) Force the two-pass argmax + DMA row-gather path (used for very large vocabularies).
    _run_case(keys[4], 2, 8, 64, 32, use_gather=True)
    print("KERNEL_OK")
</pallas_src>

<mosaic_0001>
module attributes {stable_mosaic.version = 11 : i64} {
  func.func @_onehot_matmul_kernel(%arg0: i32, %arg1: memref<16x64xf32, #tpu.memory_space<vmem>>, %arg2: memref<64x128xf32, #tpu.memory_space<vmem>>, %arg3: memref<16x128xf32, #tpu.memory_space<vmem>>) attributes {dimension_semantics = [#tpu.dimension_semantics<parallel>], iteration_bounds = array<i64: 1>, scalar_prefetch = 0 : i64, scratch_operands = 0 : i64, tpu.core_type = #tpu.core_type<tc>, window_params = [{transform_indices = @transform_0, window_bounds = array<i64: 16, 64>}, {pipeline_mode = #tpu.pipeline_mode<synchronous>, transform_indices = @transform_1, window_bounds = array<i64: 64, 128>}, {transform_indices = @transform_2, window_bounds = array<i64: 16, 128>}]} {
    %c0 = arith.constant 0 : index
    %c0_0 = arith.constant 0 : index
    %0 = vector.load %arg1[%c0, %c0_0] : memref<16x64xf32, #tpu.memory_space<vmem>>, vector<16x64xf32>
    %1 = tpu.reduce_index %0 {axis = 1 : i32, kind = #tpu.reduction_kind<arg_max>} : vector<16x64xf32> -> vector<16xi32>
    %2 = vector.shape_cast %1 : vector<16xi32> to vector<16x1xi32>
    %3 = tpu.iota {dimensions = array<i32: 1>} : vector<16x64xi32>
    %4 = vector.broadcast %2 : vector<16x1xi32> to vector<16x64xi32>
    %5 = arith.cmpi eq, %3, %4 : vector<16x64xi32>
    %6 = arith.extui %5 : vector<16x64xi1> to vector<16x64xi32>
    %7 = arith.sitofp %6 : vector<16x64xi32> to vector<16x64xf32>
    %c0_1 = arith.constant 0 : index
    %c0_2 = arith.constant 0 : index
    %8 = vector.load %arg2[%c0_1, %c0_2] : memref<64x128xf32, #tpu.memory_space<vmem>>, vector<64x128xf32>
    %cst = arith.constant dense<0.000000e+00> : vector<16x128xf32>
    %9 = tpu.matmul %7, %8, %cst {dimension_numbers = #tpu.dot_dimension_numbers<[1], [0], [0], [1], [0, 0, 1, 1], [], []>} : vector<16x64xf32>, vector<64x128xf32>, vector<16x128xf32> -> vector<16x128xf32>
    %c0_3 = arith.constant 0 : index
    %c0_4 = arith.constant 0 : index
    %10 = vector.load %arg3[%c0_3, %c0_4] : memref<16x128xf32, #tpu.memory_space<vmem>>, vector<16x128xf32>
    tpu.vector_store %arg3[%c0_3, %c0_4], %9 {strides = array<i32>} : memref<16x128xf32, #tpu.memory_space<vmem>>, vector<16x128xf32>,
    return
  }
  func.func @transform_0(%arg0: i32) -> (i32, i32) {
    %c0_i32 = arith.constant 0 : i32
    %c0_i32_0 = arith.constant 0 : i32
    return %arg0, %c0_i32 : i32, i32
  }
  func.func @transform_1(%arg0: i32) -> (i32, i32) {
    %c0_i32 = arith.constant 0 : i32
    %c0_i32_0 = arith.constant 0 : i32
    %c0_i32_1 = arith.constant 0 : i32
    return %c0_i32, %c0_i32_0 : i32, i32
  }
  func.func @transform_2(%arg0: i32) -> (i32, i32) {
    %c0_i32 = arith.constant 0 : i32
    %c0_i32_0 = arith.constant 0 : i32
    return %arg0, %c0_i32 : i32, i32
  }
}

module attributes {stable_mosaic.version = 11 : i64} {
  func.func @_onehot_matmul_kernel(%arg0: i32, %arg1: memref<16x64xf32, #tpu.memory_space<vmem>>, %arg2: memref<64x128xf32, #tpu.memory_space<vmem>>, %arg3: memref<16x128xf32, #tpu.memory_space<vmem>>) attributes {dimension_semantics = [#tpu.dimension_semantics<parallel>], iteration_bounds = array<i64: 1>, scalar_prefetch = 0 : i64, scratch_operands = 0 : i64, tpu.core_type = #tpu.core_type<tc>, window_params = [{transform_indices = @transform_0, window_bounds = array<i64: 16, 64>}, {pipeline_mode = #tpu.pipeline_mode<synchronous>, transform_indices = @transform_1, window_bounds = array<i64: 64, 128>}, {transform_indices = @transform_2, window_bounds = array<i64: 16, 128>}]} {
    %c0 = arith.constant 0 : index
    %c0_0 = arith.constant 0 : index
    %0 = vector.load %arg1[%c0, %c0_0] : memref<16x64xf32, #tpu.memory_space<vmem>>, vector<16x64xf32>
    %1 = tpu.reduce_index %0 {axis = 1 : i32, kind = #tpu.reduction_kind<arg_max>} : vector<16x64xf32> -> vector<16xi32>
    %2 = vector.shape_cast %1 : vector<16xi32> to vector<16x1xi32>
    %3 = tpu.iota {dimensions = array<i32: 1>} : vector<16x64xi32>
    %4 = vector.broadcast %2 : vector<16x1xi32> to vector<16x64xi32>
    %5 = arith.cmpi eq, %3, %4 : vector<16x64xi32>
    %6 = arith.extui %5 : vector<16x64xi1> to vector<16x64xi32>
    %7 = arith.sitofp %6 : vector<16x64xi32> to vector<16x64xf32>
    %c0_1 = arith.constant 0 : index
    %c0_2 = arith.constant 0 : index
    %8 = vector.load %arg2[%c0_1, %c0_2] : memref<64x128xf32, #tpu.memory_space<vmem>>, vector<64x128xf32>
    %cst = arith.constant dense<0.000000e+00> : vector<16x128xf32>
    %9 = tpu.matmul %7, %8, %cst {dimension_numbers = #tpu.dot_dimension_numbers<[1], [0], [0], [1], [0, 0, 1, 1], [], []>} : vector<16x64xf32>, vector<64x128xf32>, vector<16x128xf32> -> vector<16x128xf32>
    %c0_3 = arith.constant 0 : index
    %c0_4 = arith.constant 0 : index
    %10 = vector.load %arg3[%c0_3, %c0_4] : memref<16x128xf32, #tpu.memory_space<vmem>>, vector<16x128xf32>
    tpu.vector_store %arg3[%c0_3, %c0_4], %9 {strides = array<i32>} : memref<16x128xf32, #tpu.memory_space<vmem>>, vector<16x128xf32>,
    return
  }
  func.func @transform_0(%arg0: i32) -> (i32, i32) {
    %c0_i32 = arith.constant 0 : i32
    %c0_i32_0 = arith.constant 0 : i32
    return %arg0, %c0_i32 : i32, i32
  }
  func.func @transform_1(%arg0: i32) -> (i32, i32) {
    %c0_i32 = arith.constant 0 : i32
    %c0_i32_0 = arith.constant 0 : i32
    %c0_i32_1 = arith.constant 0 : i32
    return %c0_i32, %c0_i32_0 : i32, i32
  }
  func.func @transform_2(%arg0: i32) -> (i32, i32) {
    %c0_i32 = arith.constant 0 : i32
    %c0_i32_0 = arith.constant 0 : i32
    return %arg0, %c0_i32 : i32, i32
  }
}

</mosaic_0001>

<bundles_post_ra>
// kernel: tpu_custom_call.1
= control target key start
LH: loop header
LB: loop body
LE: loop exit
PB: predicated region body
PF: predicated region fallthrough
CT: control target
= control target key end

     0   :  { %7 = vsyncpa [#allocation3], 0  ;;  %s314_s0 = inlined_call_operand.hbm [shape: f32[16,64], index: 0, kind: input, shape index: {}]   ;;  %s315_s1 = inlined_call_operand.hbm [shape: f32[64,128], index: 1, kind: input, shape index: {}]   ;;  %s316_s2 = inlined_call_operand.hbm [shape: f32[16,128], index: 2, kind: output, shape index: {}]  }
   0x1   :  { %8 = vsyncpa [#allocation6], 0 }
   0x2   :  { %9 = vsyncpa [#allocation4], 0  ;;  %s271_s9 = smov [#allocation2]  }
   0x3   :  { %s15_s10 = sshll.u32 %s271_s9, 4  ;;  %s16_s10 = int_to_ptr.vmem [resolvable:$true] %s15_s10 }
   0x4   :  { %s213_s11 = scalar_lea.vmem %s16_s10, 256  ;;  %p218_p1 = scmp.lt.s32.totalorder %s16_s10, %s16_s10 }
   0x5   :  { %p214_p0 = scmp.ne.s32.totalorder %s16_s10, %s213_s11  ;;  %p219_p2 = scmp.lt.s32.totalorder %s213_s11, %s213_s11 }
   0x7   :  { %p220_p3 = por %p219_p2, %p218_p1 }
   0x9   :  { %p221_p4 = pnand %p220_p3, %p214_p0 }
   0xb   :  { %224 = shalt.err (!%p221_p4)
}
   0xc   :  { %s272_s12 = smov 128   ;;  %s273_s13 = smov 8  }
   0xd   :  { %21 = dma.hbm_to_vmem [thread:$0]  %s314_s0, 256, %s16_s10, [#allocation3], %s272_s12, %s272_s12, %s273_s13  }
   0xe   :  { %s274_s16 = smov [#allocation5]  }
   0xf   :  { %s27_s17 = sshll.u32 %s274_s16, 4  ;;  %s28_s17 = int_to_ptr.vmem [resolvable:$true] %s27_s17 }
  0x10   :  { %s233_s18 = scalar_lea.vmem %s28_s17, 1024  ;;  %p238_p6 = scmp.lt.s32.totalorder %s28_s17, %s28_s17 }
  0x11   :  { %p234_p5 = scmp.ne.s32.totalorder %s28_s17, %s233_s18  ;;  %p239_p7 = scmp.lt.s32.totalorder %s233_s18, %s233_s18 }
  0x13   :  { %p240_p8 = por %p239_p7, %p238_p6 }
  0x15   :  { %p241_p9 = pnand %p240_p8, %p234_p5 }
  0x17   :  { %244 = shalt.err (!%p241_p9)
}
  0x18   :  { %33 = dma.hbm_to_vmem [thread:$0]  %s315_s1, 1024, %s28_s17, [#allocation6], %s272_s12, %s272_s12, %s273_s13  }
  0x19   :  { %265 = dma.done.wait [#allocation3], 256  }
  0x1a   :  { %266 = vsyncadd [#allocation3], 4294967040 }
  0x1b   :  { %267 = dma.done.wait [#allocation6], 1024  }
  0x1c   :  { %268 = vsyncadd [#allocation6], 4294966272  ;;  %vm42_vm0 = vcmask 523264   ;;  %v40_v0 = vld [vmem:[#allocation2] sm:$0xff]  ;;  %v41_v1 = vld [vmem:[#allocation2 + $0x8] sm:$0xff]  ;;  %v49_v12 = vlaneseq  ;;  %v275_v15 = vmov 0.0  }
  0x1d   :  { %v64_v2 = vld [vmem:[#allocation5 + $0x38] sm:$0xff]  ;;  %v43_v3 = vsel %vm42_vm0, %v40_v0, -inf  ;;  %v63_v4 = vld [vmem:[#allocation5 + $0x30] sm:$0xff]  ;;  %v62_v5 = vld [vmem:[#allocation5 + $0x28] sm:$0xff]  ;;  %v46_v6 = vsel %vm42_vm0, %v41_v1, -inf  ;;  %s276_s0 = smov [#allocation7]  }
  0x1e   :  { %180 = vmatprep.subr.mxu0 %v64_v2  ;;  %44 = vmax.index.xlane.f32.xlu0 %v43_v3  ;;  %v61_v7 = vld [vmem:[#allocation5 + $0x20] sm:$0xff]  ;;  %v60_v8 = vld [vmem:[#allocation5 + $0x18] sm:$0xff]  ;;  %v59_v9 = vld [vmem:[#allocation5 + $0x10] sm:$0xff]  ;;  %v50_v13 = vand.u32 127, %v49_v12  ;;  %s153_s1 = sshll.u32 %s276_s0, 4  ;;  %s154_s1 = int_to_ptr.vmem [resolvable:$true] %s153_s1 }
  0x1f   :  { %181 = vmatpush3.msra.mxu0 %v64_v2  ;;  %v58_v10 = vld [vmem:[#allocation5 + $0x8] sm:$0xff]  ;;  %v57_v11 = vld [vmem:[#allocation5] sm:$0xff]  ;;  %s245_s21 = scalar_lea.vmem %s154_s1, 256  ;;  %p250_p11 = scmp.lt.s32.totalorder %s154_s1, %s154_s1 }
  0x20   :  { %182 = vmatprep.subr.mxu0 %v63_v4  ;;  %p246_p10 = scmp.ne.s32.totalorder %s154_s1, %s245_s21  ;;  %p251_p12 = scmp.lt.s32.totalorder %s245_s21, %s245_s21 }
  0x21   :  { %183 = vmatpush3.msra.mxu0 %v63_v4 }
  0x22   :  { %184 = vmatprep.subr.mxu0 %v62_v5  ;;  %47 = vmax.index.xlane.f32.xlu0 %v46_v6  ;;  %p252_p13 = por %p251_p12, %p250_p11 }
  0x23   :  { %185 = vmatpush3.msra.mxu0 %v62_v5 }
  0x24   :  { %186 = vmatprep.subr.mxu0 %v61_v7  ;;  %p253_p0 = pnand %p252_p13, %p246_p10 }
  0x25   :  { %187 = vmatpush3.msra.mxu0 %v61_v7 }
  0x26   :  { %188 = vmatprep.subr.mxu0 %v60_v8 }
  0x27   :  { %189 = vmatpush3.msra.mxu0 %v60_v8 }
  0x28   :  { %190 = vmatprep.subr.mxu0 %v59_v9 }
  0x29   :  { %191 = vmatpush3.msra.mxu0 %v59_v9 }
  0x2a   :  { %192 = vmatprep.subr.mxu0 %v58_v10 }
  0x2b   :  { %193 = vmatpush3.msra.mxu0 %v58_v10 }
  0x2c   :  { %194 = vmatprep.subr.mxu0 %v57_v11 }
  0x2d   :  { %195 = vmatpush3.msra.mxu0 %v57_v11 }
  0xa7   :  { %v45_v14 = vpop.xlane.xlu0 %44 }
  0xa8   :  { %vm51_vm1 = vcmp.eq.s32.totalorder %v50_v13, %v45_v14 }
  0xa9   :  { %v166_v16 = vsel %vm51_vm1, 1.0, %v275_v15 }
  0xaa   :  { %196 = vmatprep.mubr.msk.f32.mxu0 %vm42_vm0, %v166_v16 }
  0xab   :  { %v48_v17 = vpop.xlane.xlu0 %47 }
  0xac   :  { %vm52_vm2 = vcmp.eq.s32.totalorder %v50_v13, %v48_v17 }
  0xad   :  { %v167_v18 = vsel %vm52_vm2, 1.0, %v275_v15 }
  0xae   :  { %197 = vmatmul.mubr.msk.f32.vlgmr.msra.gmra.mxu0 %vm42_vm0, %v167_v18 }
 0x16e   :  { %v198_v19 = vpop.f32.mrf.mxu0 }
 0x16f   :  { %147 = vst [vmem:[#allocation7 + $0x8] sm:$0xff] %v198_v19 }
 0x170   :  { %v137_v20 = vpop.f32.mrf.mxu0 }
 0x171   :  { %146 = vst [vmem:[#allocation7] sm:$0xff] %v137_v20 }
 0x172   :  { %256 = shalt.err (!%p253_p0)
}
 0x173   :  { %159 = dma.vmem_to_hbm [thread:$0]  %s154_s1, 256, %s316_s2, [#allocation4], %s272_s12, %s272_s12, %s273_s13  }
 0x174   :  { %269 = dma.done.wait [#allocation4], 256  }
 0x175   :  { %270 = vsyncadd [#allocation4], 4294967040 }
 0x176   :  { %163 = vsyncpa [#allocation3], 1 }
 0x177   :  { %164 = vsyncpa [#allocation6], 1 }
 0x178   :  { %165 = vsyncpa [#allocation4], 1 }

// kernel: tpu_custom_call.1
= control target key start
LH: loop header
LB: loop body
LE: loop exit
PB: predicated region body
PF: predicated region fallthrough
CT: control target
= control target key end

     0   :  { %7 = vsyncpa [#allocation3], 0  ;;  %s314_s0 = inlined_call_operand.hbm [shape: f32[16,64], index: 0, kind: input, shape index: {}]   ;;  %s315_s1 = inlined_call_operand.hbm [shape: f32[64,128], index: 1, kind: input, shape index: {}]   ;;  %s316_s2 = inlined_call_operand.hbm [shape: f32[16,128], index: 2, kind: output, shape index: {}]  }
   0x1   :  { %8 = vsyncpa [#allocation6], 0 }
   0x2   :  { %9 = vsyncpa [#allocation4], 0  ;;  %s271_s9 = smov [#allocation2]  }
   0x3   :  { %s15_s10 = sshll.u32 %s271_s9, 4  ;;  %s16_s10 = int_to_ptr.vmem [resolvable:$true] %s15_s10 }
   0x4   :  { %s213_s11 = scalar_lea.vmem %s16_s10, 256  ;;  %p218_p1 = scmp.lt.s32.totalorder %s16_s10, %s16_s10 }
   0x5   :  { %p214_p0 = scmp.ne.s32.totalorder %s16_s10, %s213_s11  ;;  %p219_p2 = scmp.lt.s32.totalorder %s213_s11, %s213_s11 }
   0x7   :  { %p220_p3 = por %p219_p2, %p218_p1 }
   0x9   :  { %p221_p4 = pnand %p220_p3, %p214_p0 }
   0xb   :  { %224 = shalt.err (!%p221_p4)
}
   0xc   :  { %s272_s12 = smov 128   ;;  %s273_s13 = smov 8  }
   0xd   :  { %21 = dma.hbm_to_vmem [thread:$0]  %s314_s0, 256, %s16_s10, [#allocation3], %s272_s12, %s272_s12, %s273_s13  }
   0xe   :  { %s274_s16 = smov [#allocation5]  }
   0xf   :  { %s27_s17 = sshll.u32 %s274_s16, 4  ;;  %s28_s17 = int_to_ptr.vmem [resolvable:$true] %s27_s17 }
  0x10   :  { %s233_s18 = scalar_lea.vmem %s28_s17, 1024  ;;  %p238_p6 = scmp.lt.s32.totalorder %s28_s17, %s28_s17 }
  0x11   :  { %p234_p5 = scmp.ne.s32.totalorder %s28_s17, %s233_s18  ;;  %p239_p7 = scmp.lt.s32.totalorder %s233_s18, %s233_s18 }
  0x13   :  { %p240_p8 = por %p239_p7, %p238_p6 }
  0x15   :  { %p241_p9 = pnand %p240_p8, %p234_p5 }
  0x17   :  { %244 = shalt.err (!%p241_p9)
}
  0x18   :  { %33 = dma.hbm_to_vmem [thread:$0]  %s315_s1, 1024, %s28_s17, [#allocation6], %s272_s12, %s272_s12, %s273_s13  }
  0x19   :  { %265 = dma.done.wait [#allocation3], 256  }
  0x1a   :  { %266 = vsyncadd [#allocation3], 4294967040 }
  0x1b   :  { %267 = dma.done.wait [#allocation6], 1024  }
  0x1c   :  { %268 = vsyncadd [#allocation6], 4294966272  ;;  %vm42_vm0 = vcmask 523264   ;;  %v40_v0 = vld [vmem:[#allocation2] sm:$0xff]  ;;  %v41_v1 = vld [vmem:[#allocation2 + $0x8] sm:$0xff]  ;;  %v49_v12 = vlaneseq  ;;  %v275_v15 = vmov 0.0  }
  0x1d   :  { %v64_v2 = vld [vmem:[#allocation5 + $0x38] sm:$0xff]  ;;  %v43_v3 = vsel %vm42_vm0, %v40_v0, -inf  ;;  %v63_v4 = vld [vmem:[#allocation5 + $0x30] sm:$0xff]  ;;  %v62_v5 = vld [vmem:[#allocation5 + $0x28] sm:$0xff]  ;;  %v46_v6 = vsel %vm42_vm0, %v41_v1, -inf  ;;  %s276_s0 = smov [#allocation7]  }
  0x1e   :  { %180 = vmatprep.subr.mxu0 %v64_v2  ;;  %44 = vmax.index.xlane.f32.xlu0 %v43_v3  ;;  %v61_v7 = vld [vmem:[#allocation5 + $0x20] sm:$0xff]  ;;  %v60_v8 = vld [vmem:[#allocation5 + $0x18] sm:$0xff]  ;;  %v59_v9 = vld [vmem:[#allocation5 + $0x10] sm:$0xff]  ;;  %v50_v13 = vand.u32 127, %v49_v12  ;;  %s153_s1 = sshll.u32 %s276_s0, 4  ;;  %s154_s1 = int_to_ptr.vmem [resolvable:$true] %s153_s1 }
  0x1f   :  { %181 = vmatpush3.msra.mxu0 %v64_v2  ;;  %v58_v10 = vld [vmem:[#allocation5 + $0x8] sm:$0xff]  ;;  %v57_v11 = vld [vmem:[#allocation5] sm:$0xff]  ;;  %s245_s21 = scalar_lea.vmem %s154_s1, 256  ;;  %p250_p11 = scmp.lt.s32.totalorder %s154_s1, %s154_s1 }
  0x20   :  { %182 = vmatprep.subr.mxu0 %v63_v4  ;;  %p246_p10 = scmp.ne.s32.totalorder %s154_s1, %s245_s21  ;;  %p251_p12 = scmp.lt.s32.totalorder %s245_s21, %s245_s21 }
  0x21   :  { %183 = vmatpush3.msra.mxu0 %v63_v4 }
  0x22   :  { %184 = vmatprep.subr.mxu0 %v62_v5  ;;  %47 = vmax.index.xlane.f32.xlu0 %v46_v6  ;;  %p252_p13 = por %p251_p12, %p250_p11 }
  0x23   :  { %185 = vmatpush3.msra.mxu0 %v62_v5 }
  0x24   :  { %186 = vmatprep.subr.mxu0 %v61_v7  ;;  %p253_p0 = pnand %p252_p13, %p246_p10 }
  0x25   :  { %187 = vmatpush3.msra.mxu0 %v61_v7 }
  0x26   :  { %188 = vmatprep.subr.mxu0 %v60_v8 }
  0x27   :  { %189 = vmatpush3.msra.mxu0 %v60_v8 }
  0x28   :  { %190 = vmatprep.subr.mxu0 %v59_v9 }
  0x29   :  { %191 = vmatpush3.msra.mxu0 %v59_v9 }
  0x2a   :  { %192 = vmatprep.subr.mxu0 %v58_v10 }
  0x2b   :  { %193 = vmatpush3.msra.mxu0 %v58_v10 }
  0x2c   :  { %194 = vmatprep.subr.mxu0 %v57_v11 }
  0x2d   :  { %195 = vmatpush3.msra.mxu0 %v57_v11 }
  0xa7   :  { %v45_v14 = vpop.xlane.xlu0 %44 }
  0xa8   :  { %vm51_vm1 = vcmp.eq.s32.totalorder %v50_v13, %v45_v14 }
  0xa9   :  { %v166_v16 = vsel %vm51_vm1, 1.0, %v275_v15 }
  0xaa   :  { %196 = vmatprep.mubr.msk.f32.mxu0 %vm42_vm0, %v166_v16 }
  0xab   :  { %v48_v17 = vpop.xlane.xlu0 %47 }
  0xac   :  { %vm52_vm2 = vcmp.eq.s32.totalorder %v50_v13, %v48_v17 }
  0xad   :  { %v167_v18 = vsel %vm52_vm2, 1.0, %v275_v15 }
  0xae   :  { %197 = vmatmul.mubr.msk.f32.vlgmr.msra.gmra.mxu0 %vm42_vm0, %v167_v18 }
 0x16e   :  { %v198_v19 = vpop.f32.mrf.mxu0 }
 0x16f   :  { %147 = vst [vmem:[#allocation7 + $0x8] sm:$0xff] %v198_v19 }
 0x170   :  { %v137_v20 = vpop.f32.mrf.mxu0 }
 0x171   :  { %146 = vst [vmem:[#allocation7] sm:$0xff] %v137_v20 }
 0x172   :  { %256 = shalt.err (!%p253_p0)
}
 0x173   :  { %159 = dma.vmem_to_hbm [thread:$0]  %s154_s1, 256, %s316_s2, [#allocation4], %s272_s12, %s272_s12, %s273_s13  }
 0x174   :  { %269 = dma.done.wait [#allocation4], 256  }
 0x175   :  { %270 = vsyncadd [#allocation4], 4294967040 }
 0x176   :  { %163 = vsyncpa [#allocation3], 1 }
 0x177   :  { %164 = vsyncpa [#allocation6], 1 }
 0x178   :  { %165 = vsyncpa [#allocation4], 1 }

</bundles_post_ra>
